<compile_context>
chip_gen: v6e
topology: v6e:2x2x1
jax: 0.10.0
libtpu: 0.0.40
codegen_flags: <defaults>
</compile_context>

<pallas_src>
import functools

import jax
import jax.numpy as jnp
from jax import lax
from jax.experimental import pallas as pl
from jax.experimental.pallas import tpu as pltpu

# TODO(synk): BatchNorm is implemented in eval mode (running statistics folded with the
# conv bias into a per-channel affine); training-mode batch statistics are not computed.


def _down_kernel(x_ref, pool_ref, mask_ref,
                 w1_ref, s1_ref, b1_ref,
                 w2_ref, s2_ref, b2_ref,
                 out_ref, patch1_ref, patch2_ref,
                 *, C_in, C_out, H, W, Hq, Wq):
    x = x_ref[0]                       # (C_in, H*W)   f32
    masks = mask_ref[...]              # (9, Hq*Wq)    f32 zero-pad masks (static)

    # ---- MaxPool2d(2): pairwise max via lane rolls, then one-hot compaction on the MXU.
    m1 = jnp.maximum(x, jnp.roll(x, -1, axis=1))        # max(x[p], x[p+1])
    m2 = jnp.maximum(m1, jnp.roll(m1, -W, axis=1))      # max over 2x2 window rooted at p
    pooled = jnp.dot(m2, pool_ref[...],                  # (C_in, Hq*Wq)
                     preferred_element_type=jnp.float32)

    def conv3x3_bn_relu(feat, C, w_ref_, scale_ref_, shift_ref_, patch_ref_):
        # im2col: 9 static lane rolls + host-precomputed zero-pad masks, written into
        # a VMEM scratch, then ONE fused MXU matmul over K = 9*C.
        for n in range(9):
            di, dj = n // 3 - 1, n % 3 - 1
            s = di * Wq + dj
            shifted = feat if s == 0 else jnp.roll(feat, -s, axis=1)
            patch_ref_[pl.ds(n * C, C), :] = shifted * masks[n:n + 1, :]
        y = jnp.dot(w_ref_[...], patch_ref_[...],
                    preferred_element_type=jnp.float32)  # (C_out, Hq*Wq)
        # folded (conv bias + BatchNorm) affine, then ReLU
        return jnp.maximum(y * scale_ref_[...] + shift_ref_[...], 0.0)

    h1 = conv3x3_bn_relu(pooled, C_in, w1_ref, s1_ref, b1_ref, patch1_ref)
    h2 = conv3x3_bn_relu(h1, C_out, w2_ref, s2_ref, b2_ref, patch2_ref)
    out_ref[0] = h2


def down_pallas(x, w1, b1, g1, beta1, rm1, rv1,
                w2, b2, g2, beta2, rm2, rv2, *, eps=1e-5):
    """x: [B, C_in, H, W] (NCHW). Returns [B, C_out, H//2, W//2]."""
    B, C_in, H, W = x.shape
    C_out = w1.shape[0]
    Hq, Wq = H // 2, W // 2
    HW, HWq = H * W, Hq * Wq

    # Static one-hot compaction matrix: column q selects the top-left pixel of pool cell q.
    tl = (2 * jnp.arange(Hq)[:, None] * W + 2 * jnp.arange(Wq)[None, :]).reshape(-1)
    P = (jnp.arange(HW)[:, None] == tl[None, :]).astype(jnp.float32)       # (HW, HWq)

    # Static zero-padding masks for the nine 3x3 conv taps.
    ii = jnp.arange(HWq) // Wq
    jj = jnp.arange(HWq) % Wq
    mask_list = []
    for n in range(9):
        di, dj = n // 3 - 1, n % 3 - 1
        m = (ii + di >= 0) & (ii + di < Hq) & (jj + dj >= 0) & (jj + dj < Wq)
        mask_list.append(m)
    masks = jnp.stack(mask_list).astype(jnp.float32)                        # (9, HWq)

    def fold(w, b, g, beta, mean, var):
        # Conv bias + eval-mode BatchNorm folded into per-channel scale/shift.
        scale = g / jnp.sqrt(var + eps)
        shift = beta + (b - mean) * scale
        # (O, C, 3, 3) -> (O, 9*C) with column index (kr*3+kc)*C + c
        wf = jnp.transpose(w, (0, 2, 3, 1)).reshape(w.shape[0], -1)
        return (wf.astype(jnp.float32),
                scale.reshape(-1, 1).astype(jnp.float32),
                shift.reshape(-1, 1).astype(jnp.float32))

    w1f, s1, sh1 = fold(w1, b1, g1, beta1, rm1, rv1)
    w2f, s2, sh2 = fold(w2, b2, g2, beta2, rm2, rv2)

    x_flat = x.reshape(B, C_in, HW).astype(jnp.float32)

    kernel = functools.partial(_down_kernel, C_in=C_in, C_out=C_out,
                               H=H, W=W, Hq=Hq, Wq=Wq)

    out_flat = pl.pallas_call(
        kernel,
        out_shape=jax.ShapeDtypeStruct((B, C_out, HWq), jnp.float32),
        grid=(B,),
        in_specs=[
            pl.BlockSpec((1, C_in, HW), lambda b: (b, 0, 0)),
            pl.BlockSpec((HW, HWq), lambda b: (0, 0)),
            pl.BlockSpec((9, HWq), lambda b: (0, 0)),
            pl.BlockSpec((C_out, 9 * C_in), lambda b: (0, 0)),
            pl.BlockSpec((C_out, 1), lambda b: (0, 0)),
            pl.BlockSpec((C_out, 1), lambda b: (0, 0)),
            pl.BlockSpec((C_out, 9 * C_out), lambda b: (0, 0)),
            pl.BlockSpec((C_out, 1), lambda b: (0, 0)),
            pl.BlockSpec((C_out, 1), lambda b: (0, 0)),
        ],
        out_specs=pl.BlockSpec((1, C_out, HWq), lambda b: (b, 0, 0)),
        scratch_shapes=[pltpu.VMEM((9 * C_in, HWq), jnp.float32),
                        pltpu.VMEM((9 * C_out, HWq), jnp.float32)],
        compiler_params=pltpu.CompilerParams(
            dimension_semantics=("parallel",),
            vmem_limit_bytes=32 * 1024 * 1024),
    )(x_flat, P, masks, w1f, s1, sh1, w2f, s2, sh2)

    return out_flat.reshape(B, C_out, Hq, Wq)


def down_ref(x, w1, b1, g1, beta1, rm1, rv1,
             w2, b2, g2, beta2, rm2, rv2, *, eps=1e-5):
    """Pure-JAX reference mirroring the PyTorch forward (eval-mode BN)."""
    pooled = lax.reduce_window(x, -jnp.inf, lax.max,
                               (1, 1, 2, 2), (1, 1, 2, 2), "VALID")

    def conv_bn_relu(h, w, b, g, beta, mean, var):
        y = lax.conv_general_dilated(h, w, (1, 1), ((1, 1), (1, 1)),
                                     dimension_numbers=("NCHW", "OIHW", "NCHW"),
                                     precision="highest")
        y = y + b[None, :, None, None]
        y = (y - mean[None, :, None, None]) \
            * (g / jnp.sqrt(var + eps))[None, :, None, None] \
            + beta[None, :, None, None]
        return jnp.maximum(y, 0.0)

    h = conv_bn_relu(pooled, w1, b1, g1, beta1, rm1, rv1)
    return conv_bn_relu(h, w2, b2, g2, beta2, rm2, rv2)


if __name__ == "__main__":
    key = jax.random.PRNGKey(0)
    keys = jax.random.split(key, 13)

    B, C_in, C_out, H, W = 2, 4, 8, 16, 16
    eps = 1e-5

    x = jax.random.normal(keys[0], (B, C_in, H, W), jnp.float32)

    w1 = 0.2 * jax.random.normal(keys[1], (C_out, C_in, 3, 3), jnp.float32)
    b1 = 0.1 * jax.random.normal(keys[2], (C_out,), jnp.float32)
    g1 = 1.0 + 0.1 * jax.random.normal(keys[3], (C_out,), jnp.float32)
    beta1 = 0.1 * jax.random.normal(keys[4], (C_out,), jnp.float32)
    rm1 = 0.1 * jax.random.normal(keys[5], (C_out,), jnp.float32)
    rv1 = jax.random.uniform(keys[6], (C_out,), jnp.float32, minval=0.5, maxval=1.5)

    w2 = 0.2 * jax.random.normal(keys[7], (C_out, C_out, 3, 3), jnp.float32)
    b2 = 0.1 * jax.random.normal(keys[8], (C_out,), jnp.float32)
    g2 = 1.0 + 0.1 * jax.random.normal(keys[9], (C_out,), jnp.float32)
    beta2 = 0.1 * jax.random.normal(keys[10], (C_out,), jnp.float32)
    rm2 = 0.1 * jax.random.normal(keys[11], (C_out,), jnp.float32)
    rv2 = jax.random.uniform(keys[12], (C_out,), jnp.float32, minval=0.5, maxval=1.5)

    out = down_pallas(x, w1, b1, g1, beta1, rm1, rv1,
                      w2, b2, g2, beta2, rm2, rv2, eps=eps)
    out = jax.block_until_ready(out)

    ref = down_ref(x, w1, b1, g1, beta1, rm1, rv1,
                   w2, b2, g2, beta2, rm2, rv2, eps=eps)

    assert out.shape == (B, C_out, H // 2, W // 2)
    assert bool(jnp.allclose(out, ref, atol=1e-3, rtol=1e-3))

    print("KERNEL_OK")
</pallas_src>

<mosaic_0001>
module attributes {stable_mosaic.version = 11 : i64} {
  func.func @_down_kernel(%arg0: i32, %arg1: memref<1x4x256xf32, #tpu.memory_space<vmem>>, %arg2: memref<256x64xf32, #tpu.memory_space<vmem>>, %arg3: memref<9x64xf32, #tpu.memory_space<vmem>>, %arg4: memref<8x36xf32, #tpu.memory_space<vmem>>, %arg5: memref<8x1xf32, #tpu.memory_space<vmem>>, %arg6: memref<8x1xf32, #tpu.memory_space<vmem>>, %arg7: memref<8x72xf32, #tpu.memory_space<vmem>>, %arg8: memref<8x1xf32, #tpu.memory_space<vmem>>, %arg9: memref<8x1xf32, #tpu.memory_space<vmem>>, %arg10: memref<1x8x64xf32, #tpu.memory_space<vmem>>, %arg11: memref<36x64xf32, #tpu.memory_space<vmem>>, %arg12: memref<72x64xf32, #tpu.memory_space<vmem>>) attributes {dimension_semantics = [#tpu.dimension_semantics<parallel>], iteration_bounds = array<i64: 2>, scalar_prefetch = 0 : i64, scratch_operands = 2 : i64, tpu.core_type = #tpu.core_type<tc>, window_params = [{transform_indices = @transform_0, window_bounds = array<i64: 1, 4, 256>}, {pipeline_mode = #tpu.pipeline_mode<synchronous>, transform_indices = @transform_1, window_bounds = array<i64: 256, 64>}, {pipeline_mode = #tpu.pipeline_mode<synchronous>, transform_indices = @transform_2, window_bounds = array<i64: 9, 64>}, {pipeline_mode = #tpu.pipeline_mode<synchronous>, transform_indices = @transform_3, window_bounds = array<i64: 8, 36>}, {pipeline_mode = #tpu.pipeline_mode<synchronous>, transform_indices = @transform_4, window_bounds = array<i64: 8, 1>}, {pipeline_mode = #tpu.pipeline_mode<synchronous>, transform_indices = @transform_5, window_bounds = array<i64: 8, 1>}, {pipeline_mode = #tpu.pipeline_mode<synchronous>, transform_indices = @transform_6, window_bounds = array<i64: 8, 72>}, {pipeline_mode = #tpu.pipeline_mode<synchronous>, transform_indices = @transform_7, window_bounds = array<i64: 8, 1>}, {pipeline_mode = #tpu.pipeline_mode<synchronous>, transform_indices = @transform_8, window_bounds = array<i64: 8, 1>}, {transform_indices = @transform_9, window_bounds = array<i64: 1, 8, 64>}]} {
    %c0 = arith.constant 0 : index
    %c0_0 = arith.constant 0 : index
    %c0_1 = arith.constant 0 : index
    %0 = vector.load %arg1[%c0, %c0_0, %c0_1] : memref<1x4x256xf32, #tpu.memory_space<vmem>>, vector<1x4x256xf32>
    %1 = vector.shape_cast %0 : vector<1x4x256xf32> to vector<4x256xf32>
    %c0_2 = arith.constant 0 : index
    %c0_3 = arith.constant 0 : index
    %2 = vector.load %arg3[%c0_2, %c0_3] : memref<9x64xf32, #tpu.memory_space<vmem>>, vector<9x64xf32>
    %3 = vector.extract_strided_slice %1 {offsets = [0, 1], sizes = [4, 255], strides = [1, 1]} : vector<4x256xf32> to vector<4x255xf32>
    %4 = vector.extract_strided_slice %1 {offsets = [0, 0], sizes = [4, 1], strides = [1, 1]} : vector<4x256xf32> to vector<4x1xf32>
    %5 = tpu.concatenate %3, %4 in 1 : vector<4x255xf32>, vector<4x1xf32> -> vector<4x256xf32>
    %6 = arith.maximumf %1, %5 : vector<4x256xf32>
    %7 = vector.extract_strided_slice %6 {offsets = [0, 16], sizes = [4, 240], strides = [1, 1]} : vector<4x256xf32> to vector<4x240xf32>
    %8 = vector.extract_strided_slice %6 {offsets = [0, 0], sizes = [4, 16], strides = [1, 1]} : vector<4x256xf32> to vector<4x16xf32>
    %9 = tpu.concatenate %7, %8 in 1 : vector<4x240xf32>, vector<4x16xf32> -> vector<4x256xf32>
    %10 = arith.maximumf %6, %9 : vector<4x256xf32>
    %c0_4 = arith.constant 0 : index
    %c0_5 = arith.constant 0 : index
    %11 = vector.load %arg2[%c0_4, %c0_5] : memref<256x64xf32, #tpu.memory_space<vmem>>, vector<256x64xf32>
    %cst = arith.constant dense<0.000000e+00> : vector<4x64xf32>
    %12 = tpu.matmul %10, %11, %cst {dimension_numbers = #tpu.dot_dimension_numbers<[1], [0], [0], [1], [0, 0, 1, 1], [], []>} : vector<4x256xf32>, vector<256x64xf32>, vector<4x64xf32> -> vector<4x64xf32>
    %13 = vector.extract_strided_slice %12 {offsets = [0, 55], sizes = [4, 9], strides = [1, 1]} : vector<4x64xf32> to vector<4x9xf32>
    %14 = vector.extract_strided_slice %12 {offsets = [0, 0], sizes = [4, 55], strides = [1, 1]} : vector<4x64xf32> to vector<4x55xf32>
    %15 = tpu.concatenate %13, %14 in 1 : vector<4x9xf32>, vector<4x55xf32> -> vector<4x64xf32>
    %16 = vector.extract_strided_slice %2 {offsets = [0, 0], sizes = [1, 64], strides = [1, 1]} : vector<9x64xf32> to vector<1x64xf32>
    %17 = vector.broadcast %16 : vector<1x64xf32> to vector<4x64xf32>
    %18 = arith.mulf %15, %17 : vector<4x64xf32>
    %c0_6 = arith.constant 0 : index
    %c0_7 = arith.constant 0 : index
    %19 = vector.load %arg11[%c0_6, %c0_7] : memref<36x64xf32, #tpu.memory_space<vmem>>, vector<4x64xf32>
    tpu.vector_store %arg11[%c0_6, %c0_7], %18 {strides = array<i32>} : memref<36x64xf32, #tpu.memory_space<vmem>>, vector<4x64xf32>,
    %20 = vector.extract_strided_slice %12 {offsets = [0, 56], sizes = [4, 8], strides = [1, 1]} : vector<4x64xf32> to vector<4x8xf32>
    %21 = vector.extract_strided_slice %12 {offsets = [0, 0], sizes = [4, 56], strides = [1, 1]} : vector<4x64xf32> to vector<4x56xf32>
    %22 = tpu.concatenate %20, %21 in 1 : vector<4x8xf32>, vector<4x56xf32> -> vector<4x64xf32>
    %23 = vector.extract_strided_slice %2 {offsets = [1, 0], sizes = [1, 64], strides = [1, 1]} : vector<9x64xf32> to vector<1x64xf32>
    %24 = vector.broadcast %23 : vector<1x64xf32> to vector<4x64xf32>
    %25 = arith.mulf %22, %24 : vector<4x64xf32>
    %c4 = arith.constant 4 : index
    %c0_8 = arith.constant 0 : index
    %26 = vector.load %arg11[%c4, %c0_8] : memref<36x64xf32, #tpu.memory_space<vmem>>, vector<4x64xf32>
    tpu.vector_store %arg11[%c4, %c0_8], %25 {strides = array<i32>} : memref<36x64xf32, #tpu.memory_space<vmem>>, vector<4x64xf32>,
    %27 = vector.extract_strided_slice %12 {offsets = [0, 57], sizes = [4, 7], strides = [1, 1]} : vector<4x64xf32> to vector<4x7xf32>
    %28 = vector.extract_strided_slice %12 {offsets = [0, 0], sizes = [4, 57], strides = [1, 1]} : vector<4x64xf32> to vector<4x57xf32>
    %29 = tpu.concatenate %27, %28 in 1 : vector<4x7xf32>, vector<4x57xf32> -> vector<4x64xf32>
    %30 = vector.extract_strided_slice %2 {offsets = [2, 0], sizes = [1, 64], strides = [1, 1]} : vector<9x64xf32> to vector<1x64xf32>
    %31 = vector.broadcast %30 : vector<1x64xf32> to vector<4x64xf32>
    %32 = arith.mulf %29, %31 : vector<4x64xf32>
    %c8 = arith.constant 8 : index
    %c0_9 = arith.constant 0 : index
    %33 = vector.load %arg11[%c8, %c0_9] : memref<36x64xf32, #tpu.memory_space<vmem>>, vector<4x64xf32>
    tpu.vector_store %arg11[%c8, %c0_9], %32 {strides = array<i32>} : memref<36x64xf32, #tpu.memory_space<vmem>>, vector<4x64xf32>,
    %34 = vector.extract_strided_slice %12 {offsets = [0, 63], sizes = [4, 1], strides = [1, 1]} : vector<4x64xf32> to vector<4x1xf32>
    %35 = vector.extract_strided_slice %12 {offsets = [0, 0], sizes = [4, 63], strides = [1, 1]} : vector<4x64xf32> to vector<4x63xf32>
    %36 = tpu.concatenate %34, %35 in 1 : vector<4x1xf32>, vector<4x63xf32> -> vector<4x64xf32>
    %37 = vector.extract_strided_slice %2 {offsets = [3, 0], sizes = [1, 64], strides = [1, 1]} : vector<9x64xf32> to vector<1x64xf32>
    %38 = vector.broadcast %37 : vector<1x64xf32> to vector<4x64xf32>
    %39 = arith.mulf %36, %38 : vector<4x64xf32>
    %c12 = arith.constant 12 : index
    %c0_10 = arith.constant 0 : index
    %40 = vector.load %arg11[%c12, %c0_10] : memref<36x64xf32, #tpu.memory_space<vmem>>, vector<4x64xf32>
    tpu.vector_store %arg11[%c12, %c0_10], %39 {strides = array<i32>} : memref<36x64xf32, #tpu.memory_space<vmem>>, vector<4x64xf32>,
    %41 = vector.extract_strided_slice %2 {offsets = [4, 0], sizes = [1, 64], strides = [1, 1]} : vector<9x64xf32> to vector<1x64xf32>
    %42 = vector.broadcast %41 : vector<1x64xf32> to vector<4x64xf32>
    %43 = arith.mulf %12, %42 : vector<4x64xf32>
    %c16 = arith.constant 16 : index
    %c0_11 = arith.constant 0 : index
    %44 = vector.load %arg11[%c16, %c0_11] : memref<36x64xf32, #tpu.memory_space<vmem>>, vector<4x64xf32>
    tpu.vector_store %arg11[%c16, %c0_11], %43 {strides = array<i32>} : memref<36x64xf32, #tpu.memory_space<vmem>>, vector<4x64xf32>,
    %45 = vector.extract_strided_slice %12 {offsets = [0, 1], sizes = [4, 63], strides = [1, 1]} : vector<4x64xf32> to vector<4x63xf32>
    %46 = vector.extract_strided_slice %12 {offsets = [0, 0], sizes = [4, 1], strides = [1, 1]} : vector<4x64xf32> to vector<4x1xf32>
    %47 = tpu.concatenate %45, %46 in 1 : vector<4x63xf32>, vector<4x1xf32> -> vector<4x64xf32>
    %48 = vector.extract_strided_slice %2 {offsets = [5, 0], sizes = [1, 64], strides = [1, 1]} : vector<9x64xf32> to vector<1x64xf32>
    %49 = vector.broadcast %48 : vector<1x64xf32> to vector<4x64xf32>
    %50 = arith.mulf %47, %49 : vector<4x64xf32>
    %c20 = arith.constant 20 : index
    %c0_12 = arith.constant 0 : index
    %51 = vector.load %arg11[%c20, %c0_12] : memref<36x64xf32, #tpu.memory_space<vmem>>, vector<4x64xf32>
    tpu.vector_store %arg11[%c20, %c0_12], %50 {strides = array<i32>} : memref<36x64xf32, #tpu.memory_space<vmem>>, vector<4x64xf32>,
    %52 = vector.extract_strided_slice %12 {offsets = [0, 7], sizes = [4, 57], strides = [1, 1]} : vector<4x64xf32> to vector<4x57xf32>
    %53 = vector.extract_strided_slice %12 {offsets = [0, 0], sizes = [4, 7], strides = [1, 1]} : vector<4x64xf32> to vector<4x7xf32>
    %54 = tpu.concatenate %52, %53 in 1 : vector<4x57xf32>, vector<4x7xf32> -> vector<4x64xf32>
    %55 = vector.extract_strided_slice %2 {offsets = [6, 0], sizes = [1, 64], strides = [1, 1]} : vector<9x64xf32> to vector<1x64xf32>
    %56 = vector.broadcast %55 : vector<1x64xf32> to vector<4x64xf32>
    %57 = arith.mulf %54, %56 : vector<4x64xf32>
    %c24 = arith.constant 24 : index
    %c0_13 = arith.constant 0 : index
    %58 = vector.load %arg11[%c24, %c0_13] : memref<36x64xf32, #tpu.memory_space<vmem>>, vector<4x64xf32>
    tpu.vector_store %arg11[%c24, %c0_13], %57 {strides = array<i32>} : memref<36x64xf32, #tpu.memory_space<vmem>>, vector<4x64xf32>,
    %59 = vector.extract_strided_slice %12 {offsets = [0, 8], sizes = [4, 56], strides = [1, 1]} : vector<4x64xf32> to vector<4x56xf32>
    %60 = vector.extract_strided_slice %12 {offsets = [0, 0], sizes = [4, 8], strides = [1, 1]} : vector<4x64xf32> to vector<4x8xf32>
    %61 = tpu.concatenate %59, %60 in 1 : vector<4x56xf32>, vector<4x8xf32> -> vector<4x64xf32>
    %62 = vector.extract_strided_slice %2 {offsets = [7, 0], sizes = [1, 64], strides = [1, 1]} : vector<9x64xf32> to vector<1x64xf32>
    %63 = vector.broadcast %62 : vector<1x64xf32> to vector<4x64xf32>
    %64 = arith.mulf %61, %63 : vector<4x64xf32>
    %c28 = arith.constant 28 : index
    %c0_14 = arith.constant 0 : index
    %65 = vector.load %arg11[%c28, %c0_14] : memref<36x64xf32, #tpu.memory_space<vmem>>, vector<4x64xf32>
    tpu.vector_store %arg11[%c28, %c0_14], %64 {strides = array<i32>} : memref<36x64xf32, #tpu.memory_space<vmem>>, vector<4x64xf32>,
    %66 = vector.extract_strided_slice %12 {offsets = [0, 9], sizes = [4, 55], strides = [1, 1]} : vector<4x64xf32> to vector<4x55xf32>
    %67 = vector.extract_strided_slice %12 {offsets = [0, 0], sizes = [4, 9], strides = [1, 1]} : vector<4x64xf32> to vector<4x9xf32>
    %68 = tpu.concatenate %66, %67 in 1 : vector<4x55xf32>, vector<4x9xf32> -> vector<4x64xf32>
    %69 = vector.extract_strided_slice %2 {offsets = [8, 0], sizes = [1, 64], strides = [1, 1]} : vector<9x64xf32> to vector<1x64xf32>
    %70 = vector.broadcast %69 : vector<1x64xf32> to vector<4x64xf32>
    %71 = arith.mulf %68, %70 : vector<4x64xf32>
    %c32 = arith.constant 32 : index
    %c0_15 = arith.constant 0 : index
    %72 = vector.load %arg11[%c32, %c0_15] : memref<36x64xf32, #tpu.memory_space<vmem>>, vector<4x64xf32>
    tpu.vector_store %arg11[%c32, %c0_15], %71 {strides = array<i32>} : memref<36x64xf32, #tpu.memory_space<vmem>>, vector<4x64xf32>,
    %c0_16 = arith.constant 0 : index
    %c0_17 = arith.constant 0 : index
    %73 = vector.load %arg4[%c0_16, %c0_17] : memref<8x36xf32, #tpu.memory_space<vmem>>, vector<8x36xf32>
    %c0_18 = arith.constant 0 : index
    %c0_19 = arith.constant 0 : index
    %74 = vector.load %arg11[%c0_18, %c0_19] : memref<36x64xf32, #tpu.memory_space<vmem>>, vector<36x64xf32>
    %cst_20 = arith.constant dense<0.000000e+00> : vector<8x64xf32>
    %75 = tpu.matmul %73, %74, %cst_20 {dimension_numbers = #tpu.dot_dimension_numbers<[1], [0], [0], [1], [0, 0, 1, 1], [], []>} : vector<8x36xf32>, vector<36x64xf32>, vector<8x64xf32> -> vector<8x64xf32>
    %c0_21 = arith.constant 0 : index
    %c0_22 = arith.constant 0 : index
    %76 = vector.load %arg5[%c0_21, %c0_22] : memref<8x1xf32, #tpu.memory_space<vmem>>, vector<8x1xf32>
    %77 = vector.broadcast %76 : vector<8x1xf32> to vector<8x64xf32>
    %78 = arith.mulf %75, %77 : vector<8x64xf32>
    %c0_23 = arith.constant 0 : index
    %c0_24 = arith.constant 0 : index
    %79 = vector.load %arg6[%c0_23, %c0_24] : memref<8x1xf32, #tpu.memory_space<vmem>>, vector<8x1xf32>
    %80 = vector.broadcast %79 : vector<8x1xf32> to vector<8x64xf32>
    %81 = arith.addf %78, %80 : vector<8x64xf32>
    %cst_25 = arith.constant 0.000000e+00 : f32
    %82 = vector.broadcast %cst_25 : f32 to vector<8x64xf32>
    %83 = arith.maximumf %81, %82 : vector<8x64xf32>
    %84 = vector.extract_strided_slice %83 {offsets = [0, 55], sizes = [8, 9], strides = [1, 1]} : vector<8x64xf32> to vector<8x9xf32>
    %85 = vector.extract_strided_slice %83 {offsets = [0, 0], sizes = [8, 55], strides = [1, 1]} : vector<8x64xf32> to vector<8x55xf32>
    %86 = tpu.concatenate %84, %85 in 1 : vector<8x9xf32>, vector<8x55xf32> -> vector<8x64xf32>
    %87 = vector.extract_strided_slice %2 {offsets = [0, 0], sizes = [1, 64], strides = [1, 1]} : vector<9x64xf32> to vector<1x64xf32>
    %88 = vector.broadcast %87 : vector<1x64xf32> to vector<8x64xf32>
    %89 = arith.mulf %86, %88 : vector<8x64xf32>
    %c0_26 = arith.constant 0 : index
    %c0_27 = arith.constant 0 : index
    %90 = vector.load %arg12[%c0_26, %c0_27] : memref<72x64xf32, #tpu.memory_space<vmem>>, vector<8x64xf32>
    tpu.vector_store %arg12[%c0_26, %c0_27], %89 {strides = array<i32>} : memref<72x64xf32, #tpu.memory_space<vmem>>, vector<8x64xf32>,
    %91 = vector.extract_strided_slice %83 {offsets = [0, 56], sizes = [8, 8], strides = [1, 1]} : vector<8x64xf32> to vector<8x8xf32>
    %92 = vector.extract_strided_slice %83 {offsets = [0, 0], sizes = [8, 56], strides = [1, 1]} : vector<8x64xf32> to vector<8x56xf32>
    %93 = tpu.concatenate %91, %92 in 1 : vector<8x8xf32>, vector<8x56xf32> -> vector<8x64xf32>
    %94 = vector.extract_strided_slice %2 {offsets = [1, 0], sizes = [1, 64], strides = [1, 1]} : vector<9x64xf32> to vector<1x64xf32>
    %95 = vector.broadcast %94 : vector<1x64xf32> to vector<8x64xf32>
    %96 = arith.mulf %93, %95 : vector<8x64xf32>
    %c8_28 = arith.constant 8 : index
    %c0_29 = arith.constant 0 : index
    %97 = vector.load %arg12[%c8_28, %c0_29] : memref<72x64xf32, #tpu.memory_space<vmem>>, vector<8x64xf32>
    tpu.vector_store %arg12[%c8_28, %c0_29], %96 {strides = array<i32>} : memref<72x64xf32, #tpu.memory_space<vmem>>, vector<8x64xf32>,
    %98 = vector.extract_strided_slice %83 {offsets = [0, 57], sizes = [8, 7], strides = [1, 1]} : vector<8x64xf32> to vector<8x7xf32>
    %99 = vector.extract_strided_slice %83 {offsets = [0, 0], sizes = [8, 57], strides = [1, 1]} : vector<8x64xf32> to vector<8x57xf32>
    %100 = tpu.concatenate %98, %99 in 1 : vector<8x7xf32>, vector<8x57xf32> -> vector<8x64xf32>
    %101 = vector.extract_strided_slice %2 {offsets = [2, 0], sizes = [1, 64], strides = [1, 1]} : vector<9x64xf32> to vector<1x64xf32>
    %102 = vector.broadcast %101 : vector<1x64xf32> to vector<8x64xf32>
    %103 = arith.mulf %100, %102 : vector<8x64xf32>
    %c16_30 = arith.constant 16 : index
    %c0_31 = arith.constant 0 : index
    %104 = vector.load %arg12[%c16_30, %c0_31] : memref<72x64xf32, #tpu.memory_space<vmem>>, vector<8x64xf32>
    tpu.vector_store %arg12[%c16_30, %c0_31], %103 {strides = array<i32>} : memref<72x64xf32, #tpu.memory_space<vmem>>, vector<8x64xf32>,
    %105 = vector.extract_strided_slice %83 {offsets = [0, 63], sizes = [8, 1], strides = [1, 1]} : vector<8x64xf32> to vector<8x1xf32>
    %106 = vector.extract_strided_slice %83 {offsets = [0, 0], sizes = [8, 63], strides = [1, 1]} : vector<8x64xf32> to vector<8x63xf32>
    %107 = tpu.concatenate %105, %106 in 1 : vector<8x1xf32>, vector<8x63xf32> -> vector<8x64xf32>
    %108 = vector.extract_strided_slice %2 {offsets = [3, 0], sizes = [1, 64], strides = [1, 1]} : vector<9x64xf32> to vector<1x64xf32>
    %109 = vector.broadcast %108 : vector<1x64xf32> to vector<8x64xf32>
    %110 = arith.mulf %107, %109 : vector<8x64xf32>
    %c24_32 = arith.constant 24 : index
    %c0_33 = arith.constant 0 : index
    %111 = vector.load %arg12[%c24_32, %c0_33] : memref<72x64xf32, #tpu.memory_space<vmem>>, vector<8x64xf32>
    tpu.vector_store %arg12[%c24_32, %c0_33], %110 {strides = array<i32>} : memref<72x64xf32, #tpu.memory_space<vmem>>, vector<8x64xf32>,
    %112 = vector.extract_strided_slice %2 {offsets = [4, 0], sizes = [1, 64], strides = [1, 1]} : vector<9x64xf32> to vector<1x64xf32>
    %113 = vector.broadcast %112 : vector<1x64xf32> to vector<8x64xf32>
    %114 = arith.mulf %83, %113 : vector<8x64xf32>
    %c32_34 = arith.constant 32 : index
    %c0_35 = arith.constant 0 : index
    %115 = vector.load %arg12[%c32_34, %c0_35] : memref<72x64xf32, #tpu.memory_space<vmem>>, vector<8x64xf32>
    tpu.vector_store %arg12[%c32_34, %c0_35], %114 {strides = array<i32>} : memref<72x64xf32, #tpu.memory_space<vmem>>, vector<8x64xf32>,
    %116 = vector.extract_strided_slice %83 {offsets = [0, 1], sizes = [8, 63], strides = [1, 1]} : vector<8x64xf32> to vector<8x63xf32>
    %117 = vector.extract_strided_slice %83 {offsets = [0, 0], sizes = [8, 1], strides = [1, 1]} : vector<8x64xf32> to vector<8x1xf32>
    %118 = tpu.concatenate %116, %117 in 1 : vector<8x63xf32>, vector<8x1xf32> -> vector<8x64xf32>
    %119 = vector.extract_strided_slice %2 {offsets = [5, 0], sizes = [1, 64], strides = [1, 1]} : vector<9x64xf32> to vector<1x64xf32>
    %120 = vector.broadcast %119 : vector<1x64xf32> to vector<8x64xf32>
    %121 = arith.mulf %118, %120 : vector<8x64xf32>
    %c40 = arith.constant 40 : index
    %c0_36 = arith.constant 0 : index
    %122 = vector.load %arg12[%c40, %c0_36] : memref<72x64xf32, #tpu.memory_space<vmem>>, vector<8x64xf32>
    tpu.vector_store %arg12[%c40, %c0_36], %121 {strides = array<i32>} : memref<72x64xf32, #tpu.memory_space<vmem>>, vector<8x64xf32>,
    %123 = vector.extract_strided_slice %83 {offsets = [0, 7], sizes = [8, 57], strides = [1, 1]} : vector<8x64xf32> to vector<8x57xf32>
    %124 = vector.extract_strided_slice %83 {offsets = [0, 0], sizes = [8, 7], strides = [1, 1]} : vector<8x64xf32> to vector<8x7xf32>
    %125 = tpu.concatenate %123, %124 in 1 : vector<8x57xf32>, vector<8x7xf32> -> vector<8x64xf32>
    %126 = vector.extract_strided_slice %2 {offsets = [6, 0], sizes = [1, 64], strides = [1, 1]} : vector<9x64xf32> to vector<1x64xf32>
    %127 = vector.broadcast %126 : vector<1x64xf32> to vector<8x64xf32>
    %128 = arith.mulf %125, %127 : vector<8x64xf32>
    %c48 = arith.constant 48 : index
    %c0_37 = arith.constant 0 : index
    %129 = vector.load %arg12[%c48, %c0_37] : memref<72x64xf32, #tpu.memory_space<vmem>>, vector<8x64xf32>
    tpu.vector_store %arg12[%c48, %c0_37], %128 {strides = array<i32>} : memref<72x64xf32, #tpu.memory_space<vmem>>, vector<8x64xf32>,
    %130 = vector.extract_strided_slice %83 {offsets = [0, 8], sizes = [8, 56], strides = [1, 1]} : vector<8x64xf32> to vector<8x56xf32>
    %131 = vector.extract_strided_slice %83 {offsets = [0, 0], sizes = [8, 8], strides = [1, 1]} : vector<8x64xf32> to vector<8x8xf32>
    %132 = tpu.concatenate %130, %131 in 1 : vector<8x56xf32>, vector<8x8xf32> -> vector<8x64xf32>
    %133 = vector.extract_strided_slice %2 {offsets = [7, 0], sizes = [1, 64], strides = [1, 1]} : vector<9x64xf32> to vector<1x64xf32>
    %134 = vector.broadcast %133 : vector<1x64xf32> to vector<8x64xf32>
    %135 = arith.mulf %132, %134 : vector<8x64xf32>
    %c56 = arith.constant 56 : index
    %c0_38 = arith.constant 0 : index
    %136 = vector.load %arg12[%c56, %c0_38] : memref<72x64xf32, #tpu.memory_space<vmem>>, vector<8x64xf32>
    tpu.vector_store %arg12[%c56, %c0_38], %135 {strides = array<i32>} : memref<72x64xf32, #tpu.memory_space<vmem>>, vector<8x64xf32>,
    %137 = vector.extract_strided_slice %83 {offsets = [0, 9], sizes = [8, 55], strides = [1, 1]} : vector<8x64xf32> to vector<8x55xf32>
    %138 = vector.extract_strided_slice %83 {offsets = [0, 0], sizes = [8, 9], strides = [1, 1]} : vector<8x64xf32> to vector<8x9xf32>
    %139 = tpu.concatenate %137, %138 in 1 : vector<8x55xf32>, vector<8x9xf32> -> vector<8x64xf32>
    %140 = vector.extract_strided_slice %2 {offsets = [8, 0], sizes = [1, 64], strides = [1, 1]} : vector<9x64xf32> to vector<1x64xf32>
    %141 = vector.broadcast %140 : vector<1x64xf32> to vector<8x64xf32>
    %142 = arith.mulf %139, %141 : vector<8x64xf32>
    %c64 = arith.constant 64 : index
    %c0_39 = arith.constant 0 : index
    %143 = vector.load %arg12[%c64, %c0_39] : memref<72x64xf32, #tpu.memory_space<vmem>>, vector<8x64xf32>
    tpu.vector_store %arg12[%c64, %c0_39], %142 {strides = array<i32>} : memref<72x64xf32, #tpu.memory_space<vmem>>, vector<8x64xf32>,
    %c0_40 = arith.constant 0 : index
    %c0_41 = arith.constant 0 : index
    %144 = vector.load %arg7[%c0_40, %c0_41] : memref<8x72xf32, #tpu.memory_space<vmem>>, vector<8x72xf32>
    %c0_42 = arith.constant 0 : index
    %c0_43 = arith.constant 0 : index
    %145 = vector.load %arg12[%c0_42, %c0_43] : memref<72x64xf32, #tpu.memory_space<vmem>>, vector<72x64xf32>
    %cst_44 = arith.constant dense<0.000000e+00> : vector<8x64xf32>
    %146 = tpu.matmul %144, %145, %cst_44 {dimension_numbers = #tpu.dot_dimension_numbers<[1], [0], [0], [1], [0, 0, 1, 1], [], []>} : vector<8x72xf32>, vector<72x64xf32>, vector<8x64xf32> -> vector<8x64xf32>
    %c0_45 = arith.constant 0 : index
    %c0_46 = arith.constant 0 : index
    %147 = vector.load %arg8[%c0_45, %c0_46] : memref<8x1xf32, #tpu.memory_space<vmem>>, vector<8x1xf32>
    %148 = vector.broadcast %147 : vector<8x1xf32> to vector<8x64xf32>
    %149 = arith.mulf %146, %148 : vector<8x64xf32>
    %c0_47 = arith.constant 0 : index
    %c0_48 = arith.constant 0 : index
    %150 = vector.load %arg9[%c0_47, %c0_48] : memref<8x1xf32, #tpu.memory_space<vmem>>, vector<8x1xf32>
    %151 = vector.broadcast %150 : vector<8x1xf32> to vector<8x64xf32>
    %152 = arith.addf %149, %151 : vector<8x64xf32>
    %cst_49 = arith.constant 0.000000e+00 : f32
    %153 = vector.broadcast %cst_49 : f32 to vector<8x64xf32>
    %154 = arith.maximumf %152, %153 : vector<8x64xf32>
    %c0_50 = arith.constant 0 : index
    %c0_51 = arith.constant 0 : index
    %c0_52 = arith.constant 0 : index
    %155 = vector.load %arg10[%c0_50, %c0_51, %c0_52] : memref<1x8x64xf32, #tpu.memory_space<vmem>>, vector<1x8x64xf32>
    %156 = vector.shape_cast %155 : vector<1x8x64xf32> to vector<8x64xf32>
    %157 = vector.shape_cast %154 : vector<8x64xf32> to vector<1x8x64xf32>
    tpu.vector_store %arg10[%c0_50, %c0_51, %c0_52], %157 {strides = array<i32>} : memref<1x8x64xf32, #tpu.memory_space<vmem>>, vector<1x8x64xf32>,
    return
  }
  func.func @transform_0(%arg0: i32) -> (i32, i32, i32) {
    %c0_i32 = arith.constant 0 : i32
    %c0_i32_0 = arith.constant 0 : i32
    %c0_i32_1 = arith.constant 0 : i32
    return %arg0, %c0_i32, %c0_i32_0 : i32, i32, i32
  }
  func.func @transform_1(%arg0: i32) -> (i32, i32) {
    %c0_i32 = arith.constant 0 : i32
    %c0_i32_0 = arith.constant 0 : i32
    %c0_i32_1 = arith.constant 0 : i32
    return %c0_i32, %c0_i32_0 : i32, i32
  }
  func.func @transform_2(%arg0: i32) -> (i32, i32) {
    %c0_i32 = arith.constant 0 : i32
    %c0_i32_0 = arith.constant 0 : i32
    %c0_i32_1 = arith.constant 0 : i32
    return %c0_i32, %c0_i32_0 : i32, i32
  }
  func.func @transform_3(%arg0: i32) -> (i32, i32) {
    %c0_i32 = arith.constant 0 : i32
    %c0_i32_0 = arith.constant 0 : i32
    %c0_i32_1 = arith.constant 0 : i32
    return %c0_i32, %c0_i32_0 : i32, i32
  }
  func.func @transform_4(%arg0: i32) -> (i32, i32) {
    %c0_i32 = arith.constant 0 : i32
    %c0_i32_0 = arith.constant 0 : i32
    %c0_i32_1 = arith.constant 0 : i32
    return %c0_i32, %c0_i32_0 : i32, i32
  }
  func.func @transform_5(%arg0: i32) -> (i32, i32) {
    %c0_i32 = arith.constant 0 : i32
    %c0_i32_0 = arith.constant 0 : i32
    %c0_i32_1 = arith.constant 0 : i32
    return %c0_i32, %c0_i32_0 : i32, i32
  }
  func.func @transform_6(%arg0: i32) -> (i32, i32) {
    %c0_i32 = arith.constant 0 : i32
    %c0_i32_0 = arith.constant 0 : i32
    %c0_i32_1 = arith.constant 0 : i32
    return %c0_i32, %c0_i32_0 : i32, i32
  }
  func.func @transform_7(%arg0: i32) -> (i32, i32) {
    %c0_i32 = arith.constant 0 : i32
    %c0_i32_0 = arith.constant 0 : i32
    %c0_i32_1 = arith.constant 0 : i32
    return %c0_i32, %c0_i32_0 : i32, i32
  }
  func.func @transform_8(%arg0: i32) -> (i32, i32) {
    %c0_i32 = arith.constant 0 : i32
    %c0_i32_0 = arith.constant 0 : i32
    %c0_i32_1 = arith.constant 0 : i32
    return %c0_i32, %c0_i32_0 : i32, i32
  }
  func.func @transform_9(%arg0: i32) -> (i32, i32, i32) {
    %c0_i32 = arith.constant 0 : i32
    %c0_i32_0 = arith.constant 0 : i32
    %c0_i32_1 = arith.constant 0 : i32
    return %arg0, %c0_i32, %c0_i32_0 : i32, i32, i32
  }
}

</mosaic_0001>

<bundles_post_ra>
// kernel: tpu_custom_call.1
= control target key start
LH: loop header
LB: loop body
LE: loop exit
PB: predicated region body
PF: predicated region fallthrough
CT: control target
= control target key end

     0   :  { %14 = vsyncpa [#allocation5], 0  ;;  %s1589_s0 = inlined_call_operand.vmem [shape: f32[2,4,256], index: 0, kind: input, shape index: {}]   ;;  %s1590_s1 = inlined_call_operand.vmem [shape: f32[256,64], index: 1, kind: input, shape index: {}]   ;;  %s1591_s2 = inlined_call_operand.vmem [shape: f32[9,64], index: 2, kind: input, shape index: {}]   ;;  %s1592_s3 = inlined_call_operand.vmem [shape: f32[8,36], index: 3, kind: input, shape index: {}]   ;;  %s1593_s4 = inlined_call_operand.vmem [shape: f32[8,1], index: 4, kind: input, shape index: {}]   ;;  %s1594_s5 = inlined_call_operand.vmem [shape: f32[8,1], index: 5, kind: input, shape index: {}]   ;;  %s1595_s6 = inlined_call_operand.vmem [shape: f32[8,72], index: 6, kind: input, shape index: {}]   ;;  %s1596_s7 = inlined_call_operand.vmem [shape: f32[8,1], index: 7, kind: input, shape index: {}]   ;;  %s1597_s8 = inlined_call_operand.vmem [shape: f32[8,1], index: 8, kind: input, shape index: {}]   ;;  %s1598_s9 = inlined_call_operand.hbm [shape: f32[2,8,64], index: 9, kind: output, shape index: {}]  }
   0x1   :  { %16 = vsyncpa [#allocation5 + $0x1], 0  ;;  %s1233_s30 = smov 0   ;;  %s1235_s10 = smov 0  }
   0x2   :  { %s1237_s11 = smov 0   ;;  %s1239_s12 = smov 0  }
   0x3 LB: > { %s1254_s13 = sadd.s32 4294967295, %s1160_s12   ;;  %s937_s14 = sadd.s32 4294967294, %s1160_s12   ;;  %s1160_s12 = sphi %s1239_s12, %s1624_s12   ;;  %s1156_s11 = sphi %s1237_s11, %s1623_s11   ;;  %s1152_s10 = sphi %s1235_s10, %s1622_s10   ;;  %s1148_s30 = sphi %s1233_s30, %s1621_s30  }
   0x4   : > { %s1258_s15 = sadd.s32 1, %s1160_s12   ;;  %s223_s16 = sadd.s32 1, %s1156_s11 }
   0x5   : > { %s220_s17 = ssub.s32 %s1160_s12, %s1258_s15  ;;  %p233_p0 = scmp.ne.s32.totalorder %s1156_s11, %s1152_s10 }
   0x6   : > { %p221_p1 = scmp.eq.s32.totalorder %s220_s17, 0  ;;  %p234_p2 = scmp.eq.s32.totalorder %s1254_s13, 1 }
   0x7   : > { %p239_p3 = scmp.ne.s32.totalorder %s1152_s10, %s1148_s30  ;;  %p240_p4 = scmp.eq.s32.totalorder %s937_s14, 1 }
   0x8   : > { %s1269_s18 = scalar_select %p221_p1, %s1156_s11, %s223_s16  }
   0x9   : > { %p1271_p5 = por %p234_p2, %p233_p0  ;;  %p1275_p6 = por %p240_p4, %p239_p3 }
   0xa   : > { %p940_p7 = scmp.ge.s32.totalorder %s1160_s12, 1  ;;  %p290_p8 = scmp.lt.s32.totalorder %s1160_s12, 3 }
   0xc   : > { %p291_p9 = pnand %p940_p7, %p290_p8 }
   0xd   : > { %p326_p10 = scmp.lt.s32.totalorder (!%p291_p9), %s1254_s13, 1  ;;  %s1606_s26 = smov (!%p291_p9), 127  }
   0xe   : > { %294 = sbr.rel (%p291_p9) target bundleno = 1193 (0x4a9), region = 56  ;;  %s1163_s24 = smov (!%p291_p9), 112  }
   0xf   : > { %s1165_s28 = smov (!%p291_p9), 55   ;;  %s1166_s29 = smov (!%p291_p9), 119  }
  0x10   : > { %s1600_s14 = smov (!%p291_p9), 57   ;;  %s1599_s16 = smov (!%p291_p9), 121  }
  0x11   : > { %s1169_s17 = smov (!%p291_p9), 56   ;;  %s1601_s23 = smov (!%p291_p9), 7  }
  0x12   : > { %s1604_s27 = smov (!%p291_p9), 65  }
  0x13   : > { %s327_s21 = scalar_select %p326_p10, %s1254_s13, 1  ;;  %v395_v2 = vld [vmem:[%s1590_s1 + $0xf8] sm:$0xff]  ;;  %v394_v4 = vld [vmem:[%s1590_s1 + $0xf0] sm:$0xff]  ;;  %v393_v6 = vld [vmem:[%s1590_s1 + $0xe8] sm:$0xff]  ;;  %vm340_vm0 = vcmask 1039360   ;;  %vm355_vm1 = vcmask 916480   ;;  %v478_v48 = vlaneseq }
  0x14   : > { %v379_v3 = vld [vmem:[%s1590_s1 + $0x78] sm:$0xff]  ;;  %953 = vmatprep.subr.mxu0 %v395_v2  ;;  %v378_v5 = vld [vmem:[%s1590_s1 + $0x70] sm:$0xff]  ;;  %v377_v7 = vld [vmem:[%s1590_s1 + $0x68] sm:$0xff]  ;;  %v1164_v55 = vmov 0.0   ;;  %vm483_vm2 = vcmask 519168   ;;  %vm1178_vm3 = vmmov 0  }
  0x15   : > { %s952_s22 = sshll.u32 %s327_s21, 3  ;;  %954 = vmatpush3.msra.mxu0 %v379_v3  ;;  %v392_v8 = vld [vmem:[%s1590_s1 + $0xe0] sm:$0xff]  ;;  %v391_v10 = vld [vmem:[%s1590_s1 + $0xd8] sm:$0xff]  ;;  %v390_v12 = vld [vmem:[%s1590_s1 + $0xd0] sm:$0xff]  ;;  %v1390_v49 = vshrl.u32 %v478_v48, 7  ;;  %1004 = vmatprep.subr.mxu1 %v1164_v55  ;;  %s1170_s21 = smov 120  }
  0x16   : > { %s330_s25 = scalar_lea.vmem %s1589_s0, %s952_s22  ;;  %955 = vmatprep.subr.mxu0 %v394_v4  ;;  %v376_v9 = vld [vmem:[%s1590_s1 + $0x60] sm:$0xff]  ;;  %v375_v11 = vld [vmem:[%s1590_s1 + $0x58] sm:$0xff]  ;;  %v374_v13 = vld [vmem:[%s1590_s1 + $0x50] sm:$0xff]  ;;  %s1171_s22 = smov 63   ;;  %1014 = vmatprep.mubr.msk.f32.mxu1 %vm1178_vm3, %v1164_v55  ;;  %v1181_v58 = vmov 0   ;;  %vm581_vm4 = vcmask 449536  }
  0x17   : > { %v1286_v0 = vld [vmem:[%s330_s25] sm:$0xff]  ;;  %956 = vmatpush3.msra.mxu0 %v378_v5  ;;  %v389_v14 = vld [vmem:[%s1590_s1 + $0xc8] sm:$0xff]  ;;  %v387_v18 = vld [vmem:[%s1590_s1 + $0xb8] sm:$0xff]  ;;  %v529_v50 = vsub.s32 4, %v1390_v49  ;;  %s1603_s25 = smov 1   ;;  %1097 = vset.pattern.permute.xlu0 %v1181_v58  ;;  %v557_v61 = vsub.s32 6, %v1390_v49 }
  0x18   : > { %336 = vrot.lane.b32.xlu0 %v1286_v0, %s1606_s26  ;;  %v335_v1 = vcombine.high %v1286_v0, %v1286_v0  ;;  %957 = vmatprep.subr.mxu0 %v393_v6  ;;  %v373_v15 = vld [vmem:[%s1590_s1 + $0x48] sm:$0xff]  ;;  %v388_v16 = vld [vmem:[%s1590_s1 + $0xc0] sm:$0xff]  ;;  %v371_v19 = vld [vmem:[%s1590_s1 + $0x38] sm:$0xff]  ;;  %vm553_vm5 = vcmask 465920   ;;  %v571_v4 = vsub.s32 7, %v1390_v49  ;;  %vm567_vm6 = vcmask 457728  }
  0x19   : > { %958 = vmatpush3.msra.mxu0 %v377_v7  ;;  %v372_v17 = vld [vmem:[%s1590_s1 + $0x40] sm:$0xff]  ;;  %v386_v20 = vld [vmem:[%s1590_s1 + $0xb0] sm:$0xff]  ;;  %v385_v22 = vld [vmem:[%s1590_s1 + $0xa8] sm:$0xff]  ;;  %1098 = vset.pattern.permute.xlu1 %v1181_v58  ;;  %vm599_vm7 = vcmask 1043456   ;;  %vm539_vm8 = vcmask 515072   ;;  %vm505_vm9 = vcmask 56320  }
  0x1a   : > { %959 = vmatprep.subr.mxu0 %v392_v8  ;;  %v370_v21 = vld [vmem:[%s1590_s1 + $0x30] sm:$0xff]  ;;  %v369_v23 = vld [vmem:[%s1590_s1 + $0x28] sm:$0xff]  ;;  %v384_v24 = vld [vmem:[%s1590_s1 + $0xa0] sm:$0xff]  ;;  %vm519_vm10 = vcmask 7168   ;;  %vm476_vm11 = vcmask 72704   ;;  %vm491_vm12 = vcmask 64512  }
  0x1b   : > { %960 = vmatpush3.msra.mxu0 %v376_v9  ;;  %v368_v25 = vld [vmem:[%s1590_s1 + $0x20] sm:$0xff]  ;;  %v383_v27 = vld [vmem:[%s1590_s1 + $0x98] sm:$0xff]  ;;  %v382_v29 = vld [vmem:[%s1590_s1 + $0x90] sm:$0xff]  ;;  %vm595_vm13 = vcmask 293888   ;;  %vm697_vm14 = vcmask 523264   ;;  %vm774_vm15 = vcmask 588800  }
  0x1c   : > { %338 = vrot.lane.b32.xlu0 %v335_v1, %s1606_s26  ;;  %961 = vmatprep.subr.mxu0 %v391_v10  ;;  %v367_v28 = vld [vmem:[%s1590_s1 + $0x18] sm:$0xff]  ;;  %v366_v30 = vld [vmem:[%s1590_s1 + $0x10] sm:$0xff]  ;;  %v381_v31 = vld [vmem:[%s1590_s1 + $0x88] sm:$0xff]  ;;  %v543_v10 = vsub.s32 5, %v1390_v49 }
  0x1d   : > { %962 = vmatpush3.msra.mxu0 %v375_v11  ;;  %v365_v32 = vld [vmem:[%s1590_s1 + $0x8] sm:$0xff]  ;;  %v380_v34 = vld [vmem:[%s1590_s1 + $0x80] sm:$0xff] }
  0x1e   : > { %963 = vmatprep.subr.mxu0 %v390_v12  ;;  %v364_v37 = vld [vmem:[%s1590_s1] sm:$0xff]  ;;  %v1432_v62 = vld [vmem:[%s1591_s2 + $0x8] ss:$0 sm:$0xff] }
  0x1f   : > { %964 = vmatpush3.msra.mxu0 %v374_v13  ;;  %v1396_v51 = vld [vmem:[%s1591_s2] sm:$0xff] }
  0x20   : > { %965 = vmatprep.subr.mxu0 %v389_v14  ;;  %v1399_v53 = vrot.slane %v1396_v51, %v529_v50  ;;  %v673_v59 = vld [vmem:[%s1593_s4] sm:$0xff]  ;;  %v1437_v3 = vrot.slane %v1396_v51, %v557_v61  ;;  %v1444_v9 = vrot.slane %v1396_v51, %v571_v4 }
  0x21   : > { %966 = vmatpush3.msra.mxu0 %v373_v15  ;;  %v680_v60 = vld [vmem:[%s1594_s5] sm:$0xff]  ;;  %v1451_v15 = vrot.slane %v1396_v51, %v543_v10 }
  0x22   : > { %967 = vmatprep.subr.mxu0 %v388_v16  ;;  %v509_v16 = vsub.s32 2, %v1390_v49  ;;  %v589_v48 = vld [vmem:[%s1592_s3] sm:$0xff] }
  0x23   : > { %968 = vmatpush3.msra.mxu0 %v372_v17 }
  0x24   : > { %969 = vmatprep.subr.mxu0 %v387_v18 }
  0x25   : > { %970 = vmatpush3.msra.mxu0 %v371_v19 }
  0x26   : > { %971 = vmatprep.subr.mxu0 %v386_v20 }
  0x27   : > { %972 = vmatpush3.msra.mxu0 %v370_v21 }
  0x28   : > { %973 = vmatprep.subr.mxu0 %v385_v22  ;;  %v1459_v22 = vrot.slane %v1396_v51, %v509_v16 }
  0x29   : > { %974 = vmatpush3.msra.mxu0 %v369_v23  ;;  %v523_v23 = vsub.s32 3, %v1390_v49 }
  0x2a   : > { %975 = vmatprep.subr.mxu0 %v384_v24 }
  0x2b   : > { %976 = vmatpush3.msra.mxu0 %v368_v25 }
  0x2c   : > { %977 = vmatprep.subr.mxu0 %v383_v27 }
  0x2d   : > { %978 = vmatpush3.msra.mxu0 %v367_v28  ;;  %v1466_v28 = vrot.slane %v1396_v51, %v523_v23 }
  0x2e   : > { %979 = vmatprep.subr.mxu0 %v382_v29  ;;  %v480_v29 = vsub.s32 0, %v1390_v49 }
  0x2f   : > { %980 = vmatpush3.msra.mxu0 %v366_v30 }
  0x30   : > { %981 = vmatprep.subr.mxu0 %v381_v31 }
  0x31   : > { %982 = vmatpush3.msra.mxu0 %v365_v32 }
  0x32   : > { %983 = vmatprep.subr.mxu0 %v380_v34 }
  0x33   : > { %984 = vmatpush3.msra.mxu0 %v364_v37 }
  0x8a   : > { %v337_v26 = vpop.permute.xlu0 %336 }
  0x8e   : > { %v339_v33 = vpop.permute.xlu0 %338 }
  0x8f   : > { %v341_v35 = vsel %vm340_vm0, %v337_v26, %v339_v33  ;;  %v344_v36 = vsel %vm340_vm0, %v339_v33, %v337_v26 }
  0x90   : > { %v346_v38 = vcombine.low %v341_v35, %v344_v36  ;;  %v1474_v35 = vrot.slane %v1396_v51, %v480_v29  ;;  %v495_v36 = vsub.s32 1, %v1390_v49 }
  0x92   : > { %v348_v39 = vmax.f32 %v1286_v0, %v346_v38 }
  0x94   : > { %351 = vrot.lane.b32.xlu1 %v348_v39, %s1163_s24  ;;  %v350_v40 = vcombine.high %v348_v39, %v348_v39 }
  0x98   : > { %353 = vrot.lane.b32.xlu1 %v350_v40, %s1163_s24  ;;  %s1602_s24 = smov 71  }
 0x106   : > { %v352_v41 = vpop.permute.xlu1 %351 }
 0x10a   : > { %v354_v42 = vpop.permute.xlu1 %353 }
 0x10b   : > { %v356_v43 = vsel %vm355_vm1, %v352_v41, %v354_v42  ;;  %v359_v44 = vsel %vm355_vm1, %v354_v42, %v352_v41  ;;  %v1482_v42 = vrot.slane %v1396_v51, %v495_v36 }
 0x10c   : > { %v361_v45 = vcombine.low %v356_v43, %v359_v44 }
 0x10e   : > { %v363_v46 = vmax.f32 %v348_v39, %v361_v45 }
 0x110   : > { %v397_v47 = vcombine.high %v363_v46, %v363_v46 }
 0x112   : > { %463 = vmatprep.mubr.f32.mxu0 %v397_v47 }
 0x113   : > { %464 = vmatmul.mubr.f32.vlgmr.msra.gmra.mxu0 %v363_v46 }
 0x1d3   : > { %v985_v52 = vpop.f32.mrf.mxu0 }
 0x1d5   : > { %v986_v54 = vpop.f32.mrf.mxu0 }
 0x1d6   : > { %v987_v56 = vadd.f32 %v986_v54, %v985_v52 }
 0x1d8   : > { %578 = vrot.lane.b32.xlu1 %v987_v56, %s1165_s28  ;;  %575 = vrot.lane.b32.xlu0 %v987_v56, %s1166_s29  ;;  %v531_v57 = vmul.f32 %v987_v56, %v1399_v53 }
 0x1da   : > { %532 = vst.msk [vmem:[#allocation2 + $0x10] sm:$0xf] %vm483_vm2, %v531_v57 }
 0x1dc   : > { %550 = vrot.lane.b32.xlu1 %v987_v56, %s1600_s14  ;;  %547 = vrot.lane.b32.xlu0 %v987_v56, %s1599_s16  ;;  %s1605_s16 = smov 9   ;;  %s1607_s14 = smov 73  }
 0x1e0   : > { %564 = vrot.lane.b32.xlu1 %v987_v56, %s1169_s17  ;;  %561 = vrot.lane.b32.xlu0 %v987_v56, %s1170_s21 }
 0x1e4   : > { %536 = vrot.lane.b32.xlu1 %v987_v56, %s1171_s22  ;;  %533 = vrot.lane.b32.xlu0 %v987_v56, %s1606_s26  ;;  %s1617_s26 = smov 71  }
 0x1e8   : > { %502 = vrot.lane.b32.xlu1 %v987_v56, %s1601_s23  ;;  %499 = vrot.lane.b32.xlu0 %v987_v56, %s1602_s24  ;;  %s1608_s23 = smov 8   ;;  %s1180_s24 = smov 72  }
 0x1ec   : > { %516 = vrot.lane.b32.xlu1 %v987_v56, %s1603_s25  ;;  %513 = vrot.lane.b32.xlu0 %v987_v56, %s1604_s27  ;;  %s1613_s25 = smov 127   ;;  %s1614_s27 = smov 1  }
 0x1f0   : > { %473 = vrot.lane.b32.xlu1 %v987_v56, %s1605_s16  ;;  %470 = vrot.lane.b32.xlu0 %v987_v56, %s1607_s14  ;;  %s1611_s16 = smov 57   ;;  %s1618_s14 = smov 8  }
 0x1f4   : > { %488 = vrot.lane.b32.xlu1 %v987_v56, %s1608_s23  ;;  %485 = vrot.lane.b32.xlu0 %v987_v56, %s1180_s24  ;;  %s1612_s23 = smov 121  }
 0x1f8   : > { %676 = vperm.xlu0 %1097, %v673_v59   ;;  %683 = vperm.xlu1 %1098, %v680_v60   ;;  %v848_v60 = vld [vmem:[%s1596_s7] sm:$0xff] }
 0x24a   : > { %v579_v63 = vpop.permute.xlu1 %578  ;;  %v576_v0 = vpop.permute.xlu0 %575 }
 0x24b   : > { %v582_v1 = vsel %vm581_vm4, %v576_v0, %v579_v63 }
 0x24c   : > { %v587_v2 = vmul.f32 %v1432_v62, %v582_v1 }
 0x24e   : > { %588 = vst.msk [vmem:[#allocation2 + $0x20] sm:$0xf] %vm483_vm2, %v587_v2  ;;  %v551_v5 = vpop.permute.xlu1 %550  ;;  %v548_v6 = vpop.permute.xlu0 %547 }
 0x24f   : > { %v554_v7 = vsel %vm553_vm5, %v548_v6, %v551_v5 }
 0x250   : > { %v559_v8 = vmul.f32 %v1437_v3, %v554_v7 }
 0x252   : > { %560 = vst.msk [vmem:[#allocation2 + $0x18] sm:$0xf] %vm483_vm2, %v559_v8  ;;  %v565_v11 = vpop.permute.xlu1 %564  ;;  %v562_v12 = vpop.permute.xlu0 %561 }
 0x253   : > { %v568_v13 = vsel %vm567_vm6, %v562_v12, %v565_v11 }
 0x254   : > { %v573_v14 = vmul.f32 %v1444_v9, %v568_v13 }
 0x255   : > { %v594_v17 = vld [vmem:[#allocation2 + $0x20] sm:$0xf] }
 0x256   : > { %574 = vst.msk [vmem:[#allocation2 + $0x1c] sm:$0xf] %vm483_vm2, %v573_v14  ;;  %v537_v18 = vpop.permute.xlu1 %536  ;;  %1005 = vmatpush3.msk.msra.mxu1 %vm599_vm7, %v594_v17  ;;  %v534_v19 = vpop.permute.xlu0 %533 }
 0x257   : > { %v540_v20 = vsel %vm539_vm8, %v534_v19, %v537_v18  ;;  %1006 = vmatprep.subr.mxu1 %v1164_v55 }
 0x258   : > { %v545_v21 = vmul.f32 %v1451_v15, %v540_v20 }
 0x25a   : > { %546 = vst.msk [vmem:[#allocation2 + $0x14] sm:$0xf] %vm483_vm2, %v545_v21  ;;  %v503_v24 = vpop.permute.xlu1 %502  ;;  %v500_v25 = vpop.permute.xlu0 %499 }
 0x25b   : > { %v506_v26 = vsel %vm505_vm9, %v500_v25, %v503_v24 }
 0x25c   : > { %v511_v27 = vmul.f32 %v1459_v22, %v506_v26 }
 0x25d   : > { %v593_v30 = vld [vmem:[#allocation2 + $0x18] sm:$0xff] }
 0x25e   : > { %512 = vst.msk [vmem:[#allocation2 + $0x8] sm:$0xf] %vm483_vm2, %v511_v27  ;;  %v517_v31 = vpop.permute.xlu1 %516  ;;  %1007 = vmatpush3.msra.mxu1 %v593_v30  ;;  %v514_v32 = vpop.permute.xlu0 %513 }
 0x25f   : > { %v520_v33 = vsel %vm519_vm10, %v514_v32, %v517_v31  ;;  %1008 = vmatprep.subr.mxu1 %v1164_v55 }
 0x260   : > { %v525_v34 = vmul.f32 %v1466_v28, %v520_v33 }
 0x261   : > { %v592_v37 = vld [vmem:[#allocation2 + $0x10] sm:$0xff] }
 0x262   : > { %526 = vst.msk [vmem:[#allocation2 + $0xc] sm:$0xf] %vm483_vm2, %v525_v34  ;;  %v474_v38 = vpop.permute.xlu1 %473  ;;  %v471_v39 = vpop.permute.xlu0 %470  ;;  %1009 = vmatpush3.msra.mxu1 %v592_v37 }
 0x263   : > { %v477_v40 = vsel %vm476_vm11, %v471_v39, %v474_v38  ;;  %1010 = vmatprep.subr.mxu1 %v1164_v55  ;;  %v764_v38 = vld [vmem:[%s1595_s6] sm:$0xff] }
 0x264   : > { %v482_v41 = vmul.f32 %v1474_v35, %v477_v40 }
 0x266   : > { %484 = vst.msk [vmem:[#allocation2] sm:$0xf] %vm483_vm2, %v482_v41  ;;  %v489_v43 = vpop.permute.xlu1 %488  ;;  %v486_v44 = vpop.permute.xlu0 %485 }
 0x267   : > { %v492_v45 = vsel %vm491_vm12, %v486_v44, %v489_v43 }
 0x268   : > { %v497_v46 = vmul.f32 %v1482_v42, %v492_v45 }
 0x269   : > { %v591_v47 = vld [vmem:[#allocation2 + $0x8] sm:$0xff] }
 0x26a   : > { %498 = vst.msk [vmem:[#allocation2 + $0x4] sm:$0xf] %vm483_vm2, %v497_v46  ;;  %1011 = vmatpush3.msra.mxu1 %v591_v47 }
 0x26b   : > { %1012 = vmatprep.subr.mxu1 %v1164_v55 }
 0x271   : > { %v590_v49 = vld [vmem:[#allocation2] sm:$0xff] }
 0x272   : > { %1013 = vmatpush3.msra.mxu1 %v590_v49 }
 0x273   : > { %1015 = vmatmul.mubr.msk.f32.vlgmr.msra.gmra.mxu1 %vm595_vm13, %v589_v48  ;;  %1017 = vmatprep.subr.mxu1 %v1164_v55  ;;  %v677_v50 = vpop.permute.xlu0 %676  ;;  %v684_v52 = vpop.permute.xlu1 %683 }
 0x274   : > { %1035 = vmatprep.mubr.msk.f32.mxu1 %vm1178_vm3, %v1164_v55 }
 0x333   : > { %v669_v51 = vpop.f32.mrf.mxu1 }
 0x334   : > { %v679_v54 = vmul.f32 %v677_v50, %v669_v51 }
 0x335   : > { %v1016_v56 = vpop.f32.mrf.mxu1 }
 0x336   : > { %v686_v57 = vadd.f32 %v684_v52, %v679_v54 }
 0x338   : > { %v687_v58 = vmax.f32 %v686_v57, 0.0 }
 0x33a   : > { %758 = vrot.lane.b32.xlu0 %v687_v58, %s1165_s28  ;;  %755 = vrot.lane.b32.xlu1 %v687_v58, %s1166_s29  ;;  %v726_v59 = vmul.f32 %v687_v58, %v1399_v53  ;;  %s1615_s28 = smov 65   ;;  %s1616_s29 = smov 7   ;;  %v855_v53 = vld [vmem:[%s1597_s8] sm:$0xff] }
 0x33c   : > { %727 = vst.msk [vmem:[#allocation3 + $0x20] sm:$0xff] %vm697_vm14, %v726_v59 }
 0x33e   : > { %749 = vrot.lane.b32.xlu0 %v687_v58, %s1169_s17  ;;  %746 = vrot.lane.b32.xlu1 %v687_v58, %s1170_s21  ;;  %s1619_s17 = smov 9   ;;  %s1620_s21 = smov 73  }
 0x342   : > { %740 = vrot.lane.b32.xlu0 %v687_v58, %s1611_s16  ;;  %737 = vrot.lane.b32.xlu1 %v687_v58, %s1612_s23 }
 0x343   : > { %v769_v29 = vld [vmem:[#allocation3 + $0x20] sm:$0xff] }
 0x346   : > { %731 = vrot.lane.b32.xlu0 %v687_v58, %s1171_s22  ;;  %728 = vrot.lane.b32.xlu1 %v687_v58, %s1613_s25 }
 0x34a   : > { %720 = vrot.lane.b32.xlu0 %v687_v58, %s1614_s27  ;;  %717 = vrot.lane.b32.xlu1 %v687_v58, %s1615_s28  ;;  %s323_s28 = sand.u32 1, %s1152_s10  }
 0x34b   : > { %s865_s23 = scalar_lea.sflag [#allocation5], %s323_s28 }
 0x34e   : > { %711 = vrot.lane.b32.xlu0 %v687_v58, %s1616_s29  ;;  %708 = vrot.lane.b32.xlu1 %v687_v58, %s1617_s26  ;;  %s941_s29 = sshll.u32 %s323_s28, 3  ;;  %s949_s26 = sshll.u32 %s1254_s13, 7 }
 0x34f   : > { %s876_s22 = scalar_lea.hbm %s1598_s9, %s949_s26 }
 0x352   : > { %702 = vrot.lane.b32.xlu0 %v687_v58, %s1618_s14  ;;  %699 = vrot.lane.b32.xlu1 %v687_v58, %s1180_s24  ;;  %s325_s14 = scalar_lea.vmem [#allocation4], %s941_s29  ;;  %s1182_s24 = smov [#allocation4]  }
 0x353   : > { %s1104_s27 = sshll.u32 %s1182_s24, 4  ;;  %s1105_s27 = int_to_ptr.vmem [resolvable:$false] %s1104_s27 }
 0x354   : > { %s1106_s13 = scalar_lea.vmem %s1105_s27, 256 }
 0x356   : > { %692 = vrot.lane.b32.xlu0 %v687_v58, %s1619_s17  ;;  %689 = vrot.lane.b32.xlu1 %v687_v58, %s1620_s21  ;;  %s878_s17 = sshll.u32 %s325_s14, 4  ;;  %s879_s17 = int_to_ptr.vmem [resolvable:$true] %s878_s17 }
 0x357   : > { %s1100_s25 = scalar_lea.vmem %s879_s17, 128  ;;  %p1107_p0 = scmp.lt.s32.totalorder %s879_s17, %s1105_s27 }
 0x358   : > { %p1101_p11 = scmp.ne.s32.totalorder %s879_s17, %s1100_s25  ;;  %p1108_p1 = scmp.lt.s32.totalorder %s1106_s13, %s1100_s25 }
 0x35a   : > { %858 = vperm.xlu0 %1097, %v855_v53   ;;  %851 = vperm.xlu1 %1098, %v848_v60   ;;  %p1102_p12 = pnand %p1101_p11, %p1271_p5  ;;  %p1109_p2 = por %p1108_p1, %p1107_p0 }
 0x35c   : > { %p1103_p13 = pneg %p1102_p12 }
 0x35e   : > { %p1110_p3 = pnand %p1109_p2, %p1103_p13 }
 0x3ac   : > { %v759_v61 = vpop.permute.xlu0 %758  ;;  %v756_v63 = vpop.permute.xlu1 %755 }
 0x3ad   : > { %v761_v0 = vsel %vm581_vm4, %v756_v63, %v759_v61 }
 0x3ae   : > { %v762_v1 = vmul.f32 %v1432_v62, %v761_v0 }
 0x3b0   : > { %763 = vst.msk [vmem:[#allocation3 + $0x40] sm:$0xff] %vm697_vm14, %v762_v1  ;;  %v750_v2 = vpop.permute.xlu0 %749  ;;  %v747_v4 = vpop.permute.xlu1 %746 }
 0x3b1   : > { %v752_v5 = vsel %vm567_vm6, %v747_v4, %v750_v2 }
 0x3b2   : > { %v753_v6 = vmul.f32 %v752_v5, %v1444_v9 }
 0x3b4   : > { %754 = vst.msk [vmem:[#allocation3 + $0x38] sm:$0xff] %vm697_vm14, %v753_v6  ;;  %v741_v7 = vpop.permute.xlu0 %740  ;;  %v738_v8 = vpop.permute.xlu1 %737 }
 0x3b5   : > { %v743_v10 = vsel %vm553_vm5, %v738_v8, %v741_v7 }
 0x3b6   : > { %v744_v11 = vmul.f32 %v743_v10, %v1437_v3 }
 0x3b7   : > { %v773_v12 = vld [vmem:[#allocation3 + $0x40] sm:$0xff] }
 0x3b8   : > { %745 = vst.msk [vmem:[#allocation3 + $0x30] sm:$0xff] %vm697_vm14, %v744_v11  ;;  %v732_v62 = vpop.permute.xlu0 %731  ;;  %1018 = vmatpush3.msra.mxu1 %v773_v12  ;;  %v729_v13 = vpop.permute.xlu1 %728 }
 0x3b9   : > { %v734_v14 = vsel %vm539_vm8, %v729_v13, %v732_v62  ;;  %1019 = vmatprep.subr.mxu1 %v1164_v55 }
 0x3ba   : > { %v735_v9 = vmul.f32 %v734_v14, %v1451_v15 }
 0x3bb   : > { %v772_v16 = vld [vmem:[#allocation3 + $0x38] sm:$0xff] }
 0x3bc   : > { %736 = vst.msk [vmem:[#allocation3 + $0x28] sm:$0xff] %vm697_vm14, %v735_v9  ;;  %v721_v17 = vpop.permute.xlu0 %720  ;;  %1020 = vmatpush3.msra.mxu1 %v772_v16  ;;  %v718_v18 = vpop.permute.xlu1 %717 }
 0x3bd   : > { %v723_v3 = vsel %vm519_vm10, %v718_v18, %v721_v17  ;;  %1021 = vmatprep.subr.mxu1 %v1164_v55 }
 0x3be   : > { %v724_v19 = vmul.f32 %v723_v3, %v1466_v28 }
 0x3bf   : > { %v771_v20 = vld [vmem:[#allocation3 + $0x30] sm:$0xff] }
 0x3c0   : > { %725 = vst.msk [vmem:[#allocation3 + $0x18] sm:$0xff] %vm697_vm14, %v724_v19  ;;  %v712_v21 = vpop.permute.xlu0 %711  ;;  %1022 = vmatpush3.msra.mxu1 %v771_v20  ;;  %v709_v23 = vpop.permute.xlu1 %708 }
 0x3c1   : > { %v714_v15 = vsel %vm505_vm9, %v709_v23, %v712_v21  ;;  %1023 = vmatprep.subr.mxu1 %v1164_v55 }
 0x3c2   : > { %v715_v24 = vmul.f32 %v714_v15, %v1459_v22 }
 0x3c3   : > { %v770_v25 = vld [vmem:[#allocation3 + $0x28] sm:$0xff] }
 0x3c4   : > { %716 = vst.msk [vmem:[#allocation3 + $0x10] sm:$0xff] %vm697_vm14, %v715_v24  ;;  %v703_v26 = vpop.permute.xlu0 %702  ;;  %1024 = vmatpush3.msra.mxu1 %v770_v25  ;;  %v700_v27 = vpop.permute.xlu1 %699 }
 0x3c5   : > { %v705_v28 = vsel %vm491_vm12, %v700_v27, %v703_v26  ;;  %1025 = vmatprep.subr.mxu1 %v1164_v55 }
 0x3c6   : > { %v706_v30 = vmul.f32 %v705_v28, %v1482_v42  ;;  %1026 = vmatpush3.msra.mxu1 %v769_v29 }
 0x3c7   : > { %1027 = vmatprep.subr.mxu1 %v1164_v55  ;;  %v768_v31 = vld [vmem:[#allocation3 + $0x18] sm:$0xff] }
 0x3c8   : > { %707 = vst.msk [vmem:[#allocation3 + $0x8] sm:$0xff] %vm697_vm14, %v706_v30  ;;  %v693_v22 = vpop.permute.xlu0 %692  ;;  %v690_v32 = vpop.permute.xlu1 %689  ;;  %1028 = vmatpush3.msra.mxu1 %v768_v31 }
 0x3c9   : > { %v695_v33 = vsel %vm476_vm11, %v690_v32, %v693_v22  ;;  %1029 = vmatprep.subr.mxu1 %v1164_v55 }
 0x3ca   : > { %v696_v34 = vmul.f32 %v695_v33, %v1474_v35 }
 0x3cb   : > { %v767_v36 = vld [vmem:[#allocation3 + $0x10] sm:$0xff] }
 0x3cc   : > { %698 = vst.msk [vmem:[#allocation3] sm:$0xff] %vm697_vm14, %v696_v34  ;;  %1030 = vmatpush3.msra.mxu1 %v767_v36 }
 0x3cd   : > { %1031 = vmatprep.subr.mxu1 %v1164_v55 }
 0x3cf   : > { %v766_v37 = vld [vmem:[#allocation3 + $0x8] sm:$0xff] }
 0x3d0   : > { %1032 = vmatpush3.msra.mxu1 %v766_v37 }
 0x3d1   : > { %1033 = vmatprep.subr.mxu1 %v1164_v55 }
 0x3d3   : > { %v765_v39 = vld [vmem:[#allocation3] sm:$0xff] }
 0x3d4   : > { %1034 = vmatpush3.msra.mxu1 %v765_v39 }
 0x3d5   : > { %1036 = vmatmul.mubr.msk.f32.vlgmr.msra.gmra.mxu1 %vm774_vm15, %v764_v38  ;;  %v852_v35 = vpop.permute.xlu1 %851  ;;  %v859_v42 = vpop.permute.xlu0 %858 }
 0x495   : > { %v844_v40 = vpop.f32.mrf.mxu1 }
 0x496   : > { %v854_v41 = vmul.f32 %v852_v35, %v844_v40 }
 0x497   : > { %v1037_v43 = vpop.f32.mrf.mxu1 }
 0x498   : > { %v861_v55 = vadd.f32 %v859_v42, %v854_v41 }
 0x49a   : > { %v862_v44 = vmax.f32 %v861_v55, 0.0 }
 0x49c   : > { %863 = vst.msk [vmem:[%s325_s14] sm:$0xff] %vm697_vm14, %v862_v44 }
 0x49d   : > { %1113 = shalt.err (!%p1110_p3)
}
 0x49e   : > { %s1114_s29 = scalar_lea.hbm %s876_s22, 128  ;;  %s1118_s14 = scalar_lea.hbm %s1598_s9, 256 }
 0x49f   : > { %p1115_p4 = scmp.ne.s32.totalorder %s876_s22, %s1114_s29  ;;  %p1119_p9 = scmp.lt.s32.totalorder %s876_s22, %s1598_s9 }
 0x4a0   : > { %p1120_p10 = scmp.lt.s32.totalorder %s1118_s14, %s1114_s29 }
 0x4a1   : > { %p1116_p7 = pnand %p1115_p4, %p1271_p5 }
 0x4a2   : > { %p1121_p11 = por %p1120_p10, %p1119_p9 }
 0x4a3   : > { %p1117_p8 = pneg %p1116_p7 }
 0x4a5   : > { %p1122_p12 = pnand %p1121_p11, %p1117_p8 }
 0x4a7   : > { %1125 = shalt.err (!%p1122_p12)
}
 0x4a8   : > { %1038 = dma.vmem_to_hbm [thread:$0]  (%p1271_p5), %s879_s17, 128, %s876_s22, %s865_s23  }
 0x4a9 PF: > { %p1044_p13 = scmp.ge.s32.totalorder %s1160_s12, 2  ;;  %s890_s25 = sand.u32 1, %s1148_s30  }
 0x4aa   : > { %s891_s24 = scalar_lea.sflag [#allocation5], %s890_s25 }
 0x4ab   : > { %p1041_p0 = pnand %p1044_p13, %p1275_p6 }
 0x4ad   : > { %p1042_p1 = pneg %p1041_p0 }
 0x4af   : > { %1143 = dma.done.wait (%p1042_p1), %s891_s24, 128  }
 0x4b0   : > { %1145 = vsyncadd (%p1042_p1), %s891_s24, 4294967168  ;;  %p19_p2 = scmp.ge.s32.totalorder %s1258_s15, 4   ;;  %s1621_s30 = smov %s1152_s10 }
 0x4b1   : > { %s1622_s10 = smov %s1156_s11  ;;  %s1623_s11 = smov %s1269_s18 }
 0x4b2   : > { %s1624_s12 = smov %s1258_s15  ;;  %21 = sbr.rel (!%p19_p2) target bundleno = 3 (0x3), region = 91 }
 0x4b7   :  { %896 = vsyncpa [#allocation5], 1 }
 0x4b8   :  { %898 = vsyncpa [#allocation5 + $0x1], 1 }

</bundles_post_ra>
